<compile_context>
chip_gen: v7x
topology: tpu7x:2x2x1
jax: 0.10.0
libtpu: 0.0.40
codegen_flags: <defaults>
</compile_context>

<pallas_src>
import functools

import jax
import jax.numpy as jnp
from jax import lax
from jax.experimental import pallas as pl
from jax.experimental.pallas import tpu as pltpu


def _cdiv(a, b):
    return (a + b - 1) // b


def _round_up(x, m):
    return _cdiv(x, m) * m


def _num_tensorcores():
    """Best-effort TensorCores-per-chip (1 on v5e/v6e, 2 on v7x); 1 if unknown."""
    try:
        info = pltpu.get_tpu_info()
    except Exception:
        return 1
    for attr in ("num_cores_per_chip", "cores_per_chip", "tensorcores_per_chip",
                 "num_tensorcores", "tensorcore_count", "num_cores", "core_count"):
        val = getattr(info, attr, None)
        if isinstance(val, int) and val > 0:
            return max(1, min(int(val), 2))
    return 1


def _decoupled_mse_kernel(src_ref, tgt_ref, msk_ref, out_ref, *,
                          threshold, tm, lanes, tiles_per_core, total_tiles,
                          num_grid_tiles, rem_rows, check_mask_sign):
    """Accumulates 4 lane-dense partial statistics into the VMEM output block.

    out_ref block shape (1, 4, 8, lanes), f32:
      [0] sum((s - t)^2 * mask^2) over the positive bucket
      [1] sum(mask)               over the positive bucket
      [2] sum((s - t)^2 * mask^2) over all elements
      [3] sum(mask)               over all elements
    The negative bucket is derived as (total - pos) in the JAX epilogue.
    The output block is revisited across the (arbitrary) reduction axis, so it
    acts as the accumulator; it is zeroed at step 0 on each core.
    """
    t_idx = pl.program_id(1)
    g = pl.program_id(0) * tiles_per_core + t_idx        # global tile index
    groups = tm // 8

    @pl.when(t_idx == 0)
    def _init():
        out_ref[...] = jnp.zeros_like(out_ref)

    def fold(x):
        # (tm, L) -> (groups, 8, L) -> (8, L): tile-aligned reshape plus pure
        # elementwise vreg adds (no per-tile cross-lane XLU work).
        return x.reshape(groups, 8, lanes).sum(axis=0)

    def accumulate(s, t, m):
        m = m.astype(s.dtype)
        sm = s * m                                   # source * mask (native dtype)
        tmm = t * m                                  # target * mask
        d = sm - tmm
        m32 = m.astype(jnp.float32)
        dm = d.astype(jnp.float32) * m32             # upcast only for the square
        d2m2 = dm * dm                               # (s*mask_x - t*mask_x)^2
        pos = jnp.maximum(sm, tmm) >= threshold
        if check_mask_sign:                          # only needed for negative masks
            pos = jnp.logical_and(pos, m > 0)
        zeros = jnp.zeros_like(d2m2)
        out_ref[0, 0] += fold(jnp.where(pos, d2m2, zeros))   # sq   (pos bucket)
        out_ref[0, 1] += fold(jnp.where(pos, m32, zeros))    # mask (pos bucket)
        out_ref[0, 2] += fold(d2m2)                          # sq   (all)
        out_ref[0, 3] += fold(m32)                           # mask (all)

    last = total_tiles - 1
    if rem_rows == tm and num_grid_tiles == total_tiles:
        # Every grid step maps to a distinct, fully valid tile: no masking work.
        accumulate(src_ref[...], tgt_ref[...], msk_ref[...])
    else:
        @pl.when(g < last)
        def _full_tiles():
            accumulate(src_ref[...], tgt_ref[...], msk_ref[...])

        @pl.when(g == last)
        def _last_tile():
            if rem_rows == tm:
                accumulate(src_ref[...], tgt_ref[...], msk_ref[...])
            else:
                # Rows >= rem_rows overhang the array: their contents are
                # unspecified, so select them to zero before any arithmetic.
                valid = lax.broadcasted_iota(jnp.int32, (tm, lanes), 0) < rem_rows
                s = src_ref[...]
                t = tgt_ref[...]
                m = msk_ref[...]
                accumulate(jnp.where(valid, s, jnp.zeros_like(s)),
                           jnp.where(valid, t, jnp.zeros_like(t)),
                           jnp.where(valid, m, jnp.zeros_like(m)))
        # Grid slots with g > last (only when the core split does not divide the
        # tile count) fetch a clamped block and accumulate nothing.


def decoupled_mse_loss(source, target, mask,
                       threshold: float = 0.1,
                       alpha: float = 1.0,
                       beta: float = 100.0,
                       row_tile: int = 1024,
                       assume_nonnegative_mask: bool = True):
    """JAX/Pallas equivalent of DecoupledMSEloss.forward (mask required).

    `row_tile` is the row tile at lane width 512 (scaled up for narrower lane
    widths to keep ~row_tile*512-element streaming blocks).  Set
    `assume_nonnegative_mask=False` to reproduce the reference exactly when the
    mask may contain negative values; for any mask >= 0 the two are identical.
    """
    if mask is None:
        # TODO(synk): the reference module dereferences `mask` unconditionally,
        # so mask=None is not a meaningful code path; require it here.
        raise ValueError("mask is required")

    if mask.dtype == jnp.bool_:
        mask = mask.astype(source.dtype if jnp.issubdtype(source.dtype, jnp.floating)
                           else jnp.float32)

    n = int(source.size)
    if n == 0:
        return jnp.float32(0.0)

    # --- lane-dense layout selection (all static Python ints) ----------------
    # Largest L in {512, 256, 128} that divides n exactly AND leaves >= 8 rows,
    # so the (rows, L) reshape needs no padding at all.
    lane = None
    for cand in (512, 256, 128):
        if n % cand == 0 and n // cand >= 8:
            lane = cand
            break
    pad = 0
    if lane is None:
        # TODO(synk): rare fallback (flat size not a multiple of 128 or tiny
        # input): costs one small jnp.pad copy per input (< 8*128 elements).
        lane = 128
        n_target = max(_round_up(n, lane), 8 * lane)
        pad = n_target - n

    def prep(x):
        flat = x.reshape(-1)                       # native dtype, no upcast
        if pad:
            flat = jnp.pad(flat, (0, pad))         # zero-mask tail contributes nothing
        return flat.reshape(-1, lane)

    src2, tgt2, msk2 = prep(source), prep(target), prep(mask)
    rows = src2.shape[0]

    # Keep ~row_tile*512-element blocks regardless of lane width.
    target_rows = max(8, (int(row_tile) * (512 // lane)) // 8 * 8)
    tm = max(8, min(target_rows, _round_up(rows, 8)))
    total_tiles = _cdiv(rows, tm)
    rem_rows = rows - (total_tiles - 1) * tm       # rows in the last tile, (0, tm]

    nc = _num_tensorcores()
    if total_tiles < nc:
        nc = 1

    def run(num_cores):
        tpc = _cdiv(total_tiles, num_cores)
        grid_tiles = num_cores * tpc
        if grid_tiles == total_tiles:
            in_map = lambda c, t: (c * tpc + t, 0)
        else:
            # Clamp padded grid slots onto the last real block; the kernel
            # skips their accumulation (g > last).
            in_map = lambda c, t: (jnp.minimum(c * tpc + t, total_tiles - 1), 0)
        in_spec = pl.BlockSpec((tm, lane), in_map)
        kernel = functools.partial(
            _decoupled_mse_kernel,
            threshold=float(threshold), tm=tm, lanes=lane,
            tiles_per_core=tpc, total_tiles=total_tiles,
            num_grid_tiles=grid_tiles, rem_rows=rem_rows,
            check_mask_sign=not assume_nonnegative_mask)
        semantics = ((pltpu.CORE_PARALLEL, pltpu.ARBITRARY) if num_cores > 1
                     else (pltpu.ARBITRARY, pltpu.ARBITRARY))
        return pl.pallas_call(
            kernel,
            out_shape=jax.ShapeDtypeStruct((num_cores, 4, 8, lane), jnp.float32),
            grid_spec=pltpu.PrefetchScalarGridSpec(
                num_scalar_prefetch=0,
                grid=(num_cores, tpc),
                in_specs=[in_spec, in_spec, in_spec],
                out_specs=pl.BlockSpec((1, 4, 8, lane), lambda c, t: (c, 0, 0, 0)),
            ),
            compiler_params=pltpu.CompilerParams(
                dimension_semantics=semantics,
                vmem_limit_bytes=48 * 1024 * 1024),
        )(src2, tgt2, msk2)

    try:
        stats = run(nc)
    except Exception:
        if nc == 1:
            raise
        stats = run(1)       # defensive fallback if the CORE_PARALLEL split rejects

    # Final tiny cross-lane reduce + alpha/beta combine in plain JAX.
    sums = jnp.sum(stats, axis=(0, 2, 3))           # (4,)
    sq_pos, num_pos, sq_tot, m_tot = sums[0], sums[1], sums[2], sums[3]
    sq_neg = sq_tot - sq_pos
    num_neg = m_tot - num_pos

    # Mirror `if num_pos <= 0: loss_pos = 0.0 else: ... / num_pos` exactly
    # (safe denominator only used on the dead branch).
    loss_pos = jnp.where(num_pos > 0,
                         sq_pos / jnp.where(num_pos > 0, num_pos, 1.0), 0.0)
    loss_neg = jnp.where(num_neg > 0,
                         sq_neg / jnp.where(num_neg > 0, num_neg, 1.0), 0.0)
    return alpha * loss_pos + beta * loss_neg


def _reference_loss(source, target, mask, threshold=0.1, alpha=1.0, beta=100.0):
    """Pure-JAX reference mirroring the PyTorch forward (for validation)."""
    s = source * mask
    t = target * mask
    ones = jnp.ones_like(s)
    zeros = jnp.zeros_like(s)
    s_pos = jnp.where(s < threshold, zeros, ones) * mask
    t_pos = jnp.where(t < threshold, zeros, ones) * mask
    mask_pos = jnp.where(s_pos + t_pos > 0, ones, zeros) * mask
    mask_neg = jnp.where(s_pos + t_pos <= 0, ones, zeros) * mask
    num_pos = mask_pos.sum()
    num_neg = mask_neg.sum()
    lp = jnp.where(num_pos > 0,
                   jnp.sum((s * mask_pos - t * mask_pos) ** 2)
                   / jnp.where(num_pos > 0, num_pos, 1.0), 0.0)
    ln = jnp.where(num_neg > 0,
                   jnp.sum((s * mask_neg - t * mask_neg) ** 2)
                   / jnp.where(num_neg > 0, num_neg, 1.0), 0.0)
    return alpha * lp + beta * ln


if __name__ == "__main__":
    key = jax.random.PRNGKey(0)

    def make_inputs(k, shape, score_scale=0.3, drop_rate=0.3):
        k1, k2, k3 = jax.random.split(k, 3)
        # Score-map-like values spanning both sides of the 0.1 threshold so
        # both the positive and negative buckets are well populated.
        src = jax.random.uniform(k1, shape, dtype=jnp.float32) * score_scale
        tgt = jax.random.uniform(k2, shape, dtype=jnp.float32) * score_scale
        msk = (jax.random.uniform(k3, shape) > drop_rate).astype(jnp.float32)
        return src, tgt, msk

    k0, k1, k2 = jax.random.split(key, 3)

    # Primary case: small span-extraction-style score grids.
    src, tgt, msk = make_inputs(k0, (2, 4, 16, 16))
    loss = jax.block_until_ready(
        decoupled_mse_loss(src, tgt, msk, threshold=0.1, alpha=1.0, beta=100.0))
    ref = jax.block_until_ready(
        _reference_loss(src, tgt, msk, threshold=0.1, alpha=1.0, beta=100.0))
    assert jnp.allclose(loss, ref, rtol=1e-4, atol=1e-4), (loss, ref)

    # Flat size not a multiple of 128 -> exercises the small-pad fallback and
    # the exact-semantics mask-sign path.
    src, tgt, msk = make_inputs(k1, (3, 5, 24, 40))
    loss = jax.block_until_ready(
        decoupled_mse_loss(src, tgt, msk, assume_nonnegative_mask=False))
    ref = jax.block_until_ready(_reference_loss(src, tgt, msk))
    assert jnp.allclose(loss, ref, rtol=1e-4, atol=1e-4), (loss, ref)

    # Multi-tile grid with a ragged last row-tile (in-kernel iota masking and
    # accumulation across grid steps) via an artificially small row_tile.
    src, tgt, msk = make_inputs(k2, (4, 4, 32, 96))
    loss = jax.block_until_ready(decoupled_mse_loss(src, tgt, msk, row_tile=40))
    ref = jax.block_until_ready(_reference_loss(src, tgt, msk))
    assert jnp.allclose(loss, ref, rtol=1e-4, atol=1e-4), (loss, ref)

    print("KERNEL_OK")
</pallas_src>

<mosaic_0001>
module attributes {stable_mosaic.version = 11 : i64} {
  func.func @_decoupled_mse_kernel(%arg0: i32, %arg1: i32, %arg2: memref<8x256xf32, #tpu.memory_space<vmem>>, %arg3: memref<8x256xf32, #tpu.memory_space<vmem>>, %arg4: memref<8x256xf32, #tpu.memory_space<vmem>>, %arg5: memref<1x4x8x256xf32, #tpu.memory_space<vmem>>) attributes {dimension_semantics = [#tpu.dimension_semantics<arbitrary>, #tpu.dimension_semantics<arbitrary>], iteration_bounds = array<i64: 1, 1>, scalar_prefetch = 0 : i64, scratch_operands = 0 : i64, tpu.core_type = #tpu.core_type<tc>, window_params = [{transform_indices = @transform_0, window_bounds = array<i64: 8, 256>}, {transform_indices = @transform_1, window_bounds = array<i64: 8, 256>}, {transform_indices = @transform_2, window_bounds = array<i64: 8, 256>}, {transform_indices = @transform_3, window_bounds = array<i64: 1, 4, 8, 256>}]} {
    %c0_i32 = arith.constant 0 : i32
    %0 = arith.cmpi eq, %arg1, %c0_i32 : i32
    %1 = arith.extui %0 : i1 to i32
    %c0_i32_0 = arith.constant 0 : i32
    %2 = arith.cmpi ne, %1, %c0_i32_0 : i32
    scf.if %2 {
      %cst_40 = arith.constant 0.000000e+00 : f32
      %49 = vector.broadcast %cst_40 : f32 to vector<1x4x8x256xf32>
      %c0_41 = arith.constant 0 : index
      %c0_42 = arith.constant 0 : index
      %c0_43 = arith.constant 0 : index
      %c0_44 = arith.constant 0 : index
      %50 = vector.load %arg5[%c0_41, %c0_42, %c0_43, %c0_44] : memref<1x4x8x256xf32, #tpu.memory_space<vmem>>, vector<1x4x8x256xf32>
      tpu.vector_store %arg5[%c0_41, %c0_42, %c0_43, %c0_44], %49 {strides = array<i32>} : memref<1x4x8x256xf32, #tpu.memory_space<vmem>>, vector<1x4x8x256xf32>,
    } else {
    }
    %c0 = arith.constant 0 : index
    %c0_1 = arith.constant 0 : index
    %3 = vector.load %arg2[%c0, %c0_1] : memref<8x256xf32, #tpu.memory_space<vmem>>, vector<8x256xf32>
    %c0_2 = arith.constant 0 : index
    %c0_3 = arith.constant 0 : index
    %4 = vector.load %arg3[%c0_2, %c0_3] : memref<8x256xf32, #tpu.memory_space<vmem>>, vector<8x256xf32>
    %c0_4 = arith.constant 0 : index
    %c0_5 = arith.constant 0 : index
    %5 = vector.load %arg4[%c0_4, %c0_5] : memref<8x256xf32, #tpu.memory_space<vmem>>, vector<8x256xf32>
    %6 = arith.mulf %3, %5 : vector<8x256xf32>
    %7 = arith.mulf %4, %5 : vector<8x256xf32>
    %8 = arith.subf %6, %7 : vector<8x256xf32>
    %9 = arith.mulf %8, %5 : vector<8x256xf32>
    %10 = arith.mulf %9, %9 : vector<8x256xf32>
    %11 = arith.maximumf %6, %7 : vector<8x256xf32>
    %cst = arith.constant 1.000000e-01 : f32
    %12 = vector.broadcast %cst : f32 to vector<8x256xf32>
    %13 = arith.cmpf oge, %11, %12 : vector<8x256xf32>
    %cst_6 = arith.constant 0.000000e+00 : f32
    %14 = vector.broadcast %cst_6 : f32 to vector<8x256xf32>
    %c0_7 = arith.constant 0 : index
    %c0_8 = arith.constant 0 : index
    %c0_9 = arith.constant 0 : index
    %c0_10 = arith.constant 0 : index
    %15 = vector.load %arg5[%c0_7, %c0_8, %c0_9, %c0_10] : memref<1x4x8x256xf32, #tpu.memory_space<vmem>>, vector<1x1x8x256xf32>
    %16 = vector.shape_cast %15 : vector<1x1x8x256xf32> to vector<8x256xf32>
    %17 = arith.select %13, %10, %14 : vector<8x256xi1>, vector<8x256xf32>
    %18 = vector.shape_cast %17 : vector<8x256xf32> to vector<1x8x256xf32>
    %cst_11 = arith.constant dense<0.000000e+00> : vector<8x256xf32>
    %19 = vector.multi_reduction <add>, %18, %cst_11 [0] : vector<1x8x256xf32> to vector<8x256xf32>
    %20 = arith.addf %16, %19 : vector<8x256xf32>
    %c0_12 = arith.constant 0 : index
    %c0_13 = arith.constant 0 : index
    %c0_14 = arith.constant 0 : index
    %c0_15 = arith.constant 0 : index
    %21 = vector.load %arg5[%c0_12, %c0_13, %c0_14, %c0_15] : memref<1x4x8x256xf32, #tpu.memory_space<vmem>>, vector<1x1x8x256xf32>
    %22 = vector.shape_cast %21 : vector<1x1x8x256xf32> to vector<8x256xf32>
    %23 = vector.shape_cast %20 : vector<8x256xf32> to vector<1x1x8x256xf32>
    tpu.vector_store %arg5[%c0_12, %c0_13, %c0_14, %c0_15], %23 {strides = array<i32>} : memref<1x4x8x256xf32, #tpu.memory_space<vmem>>, vector<1x1x8x256xf32>,
    %c0_16 = arith.constant 0 : index
    %c1 = arith.constant 1 : index
    %c0_17 = arith.constant 0 : index
    %c0_18 = arith.constant 0 : index
    %24 = vector.load %arg5[%c0_16, %c1, %c0_17, %c0_18] : memref<1x4x8x256xf32, #tpu.memory_space<vmem>>, vector<1x1x8x256xf32>
    %25 = vector.shape_cast %24 : vector<1x1x8x256xf32> to vector<8x256xf32>
    %26 = arith.select %13, %5, %14 : vector<8x256xi1>, vector<8x256xf32>
    %27 = vector.shape_cast %26 : vector<8x256xf32> to vector<1x8x256xf32>
    %cst_19 = arith.constant dense<0.000000e+00> : vector<8x256xf32>
    %28 = vector.multi_reduction <add>, %27, %cst_19 [0] : vector<1x8x256xf32> to vector<8x256xf32>
    %29 = arith.addf %25, %28 : vector<8x256xf32>
    %c0_20 = arith.constant 0 : index
    %c1_21 = arith.constant 1 : index
    %c0_22 = arith.constant 0 : index
    %c0_23 = arith.constant 0 : index
    %30 = vector.load %arg5[%c0_20, %c1_21, %c0_22, %c0_23] : memref<1x4x8x256xf32, #tpu.memory_space<vmem>>, vector<1x1x8x256xf32>
    %31 = vector.shape_cast %30 : vector<1x1x8x256xf32> to vector<8x256xf32>
    %32 = vector.shape_cast %29 : vector<8x256xf32> to vector<1x1x8x256xf32>
    tpu.vector_store %arg5[%c0_20, %c1_21, %c0_22, %c0_23], %32 {strides = array<i32>} : memref<1x4x8x256xf32, #tpu.memory_space<vmem>>, vector<1x1x8x256xf32>,
    %c0_24 = arith.constant 0 : index
    %c2 = arith.constant 2 : index
    %c0_25 = arith.constant 0 : index
    %c0_26 = arith.constant 0 : index
    %33 = vector.load %arg5[%c0_24, %c2, %c0_25, %c0_26] : memref<1x4x8x256xf32, #tpu.memory_space<vmem>>, vector<1x1x8x256xf32>
    %34 = vector.shape_cast %33 : vector<1x1x8x256xf32> to vector<8x256xf32>
    %35 = vector.shape_cast %10 : vector<8x256xf32> to vector<1x8x256xf32>
    %cst_27 = arith.constant dense<0.000000e+00> : vector<8x256xf32>
    %36 = vector.multi_reduction <add>, %35, %cst_27 [0] : vector<1x8x256xf32> to vector<8x256xf32>
    %37 = arith.addf %34, %36 : vector<8x256xf32>
    %c0_28 = arith.constant 0 : index
    %c2_29 = arith.constant 2 : index
    %c0_30 = arith.constant 0 : index
    %c0_31 = arith.constant 0 : index
    %38 = vector.load %arg5[%c0_28, %c2_29, %c0_30, %c0_31] : memref<1x4x8x256xf32, #tpu.memory_space<vmem>>, vector<1x1x8x256xf32>
    %39 = vector.shape_cast %38 : vector<1x1x8x256xf32> to vector<8x256xf32>
    %40 = vector.shape_cast %37 : vector<8x256xf32> to vector<1x1x8x256xf32>
    tpu.vector_store %arg5[%c0_28, %c2_29, %c0_30, %c0_31], %40 {strides = array<i32>} : memref<1x4x8x256xf32, #tpu.memory_space<vmem>>, vector<1x1x8x256xf32>,
    %c0_32 = arith.constant 0 : index
    %c3 = arith.constant 3 : index
    %c0_33 = arith.constant 0 : index
    %c0_34 = arith.constant 0 : index
    %41 = vector.load %arg5[%c0_32, %c3, %c0_33, %c0_34] : memref<1x4x8x256xf32, #tpu.memory_space<vmem>>, vector<1x1x8x256xf32>
    %42 = vector.shape_cast %41 : vector<1x1x8x256xf32> to vector<8x256xf32>
    %43 = vector.shape_cast %5 : vector<8x256xf32> to vector<1x8x256xf32>
    %cst_35 = arith.constant dense<0.000000e+00> : vector<8x256xf32>
    %44 = vector.multi_reduction <add>, %43, %cst_35 [0] : vector<1x8x256xf32> to vector<8x256xf32>
    %45 = arith.addf %42, %44 : vector<8x256xf32>
    %c0_36 = arith.constant 0 : index
    %c3_37 = arith.constant 3 : index
    %c0_38 = arith.constant 0 : index
    %c0_39 = arith.constant 0 : index
    %46 = vector.load %arg5[%c0_36, %c3_37, %c0_38, %c0_39] : memref<1x4x8x256xf32, #tpu.memory_space<vmem>>, vector<1x1x8x256xf32>
    %47 = vector.shape_cast %46 : vector<1x1x8x256xf32> to vector<8x256xf32>
    %48 = vector.shape_cast %45 : vector<8x256xf32> to vector<1x1x8x256xf32>
    tpu.vector_store %arg5[%c0_36, %c3_37, %c0_38, %c0_39], %48 {strides = array<i32>} : memref<1x4x8x256xf32, #tpu.memory_space<vmem>>, vector<1x1x8x256xf32>,
    return
  }
  func.func @transform_0(%arg0: i32, %arg1: i32) -> (i32, i32) {
    %c1_i32 = arith.constant 1 : i32
    %0 = arith.muli %arg0, %c1_i32 : i32
    %1 = arith.addi %0, %arg1 : i32
    %c0_i32 = arith.constant 0 : i32
    %c0_i32_0 = arith.constant 0 : i32
    return %1, %c0_i32 : i32, i32
  }
  func.func @transform_1(%arg0: i32, %arg1: i32) -> (i32, i32) {
    %c1_i32 = arith.constant 1 : i32
    %0 = arith.muli %arg0, %c1_i32 : i32
    %1 = arith.addi %0, %arg1 : i32
    %c0_i32 = arith.constant 0 : i32
    %c0_i32_0 = arith.constant 0 : i32
    return %1, %c0_i32 : i32, i32
  }
  func.func @transform_2(%arg0: i32, %arg1: i32) -> (i32, i32) {
    %c1_i32 = arith.constant 1 : i32
    %0 = arith.muli %arg0, %c1_i32 : i32
    %1 = arith.addi %0, %arg1 : i32
    %c0_i32 = arith.constant 0 : i32
    %c0_i32_0 = arith.constant 0 : i32
    return %1, %c0_i32 : i32, i32
  }
  func.func @transform_3(%arg0: i32, %arg1: i32) -> (i32, i32, i32, i32) {
    %c0_i32 = arith.constant 0 : i32
    %c0_i32_0 = arith.constant 0 : i32
    %c0_i32_1 = arith.constant 0 : i32
    %c0_i32_2 = arith.constant 0 : i32
    return %arg0, %c0_i32, %c0_i32_0, %c0_i32_1 : i32, i32, i32, i32
  }
}

</mosaic_0001>

<bundles_post_ra>
// kernel: tpu_custom_call.1
= control target key start
LH: loop header
LB: loop body
LE: loop exit
PB: predicated region body
PF: predicated region fallthrough
CT: control target
= control target key end

     0   :  { %8 = vsyncpa [#allocation3], 0  ;;  %s329_s0 = inlined_call_operand.hbm [shape: f32[8,256], index: 0, kind: input, shape index: {}]   ;;  %s330_s1 = inlined_call_operand.hbm [shape: f32[8,256], index: 1, kind: input, shape index: {}]   ;;  %s331_s2 = inlined_call_operand.hbm [shape: f32[8,256], index: 2, kind: input, shape index: {}]   ;;  %s332_s3 = inlined_call_operand.hbm [shape: f32[1,4,8,256], index: 3, kind: output, shape index: {}]  }
   0x1   :  { %9 = vsyncpa [#allocation6], 0 }
   0x2   :  { %10 = vsyncpa [#allocation4], 0  ;;  %s255_s12 = smov [#allocation5]   ;;  %s256_s14 = smov [#allocation2]  }
   0x3   :  { %s35_s13 = sshll.u32 %s255_s12, 4  ;;  %s21_s15 = sshll.u32 %s256_s14, 4  ;;  %s36_s13 = int_to_ptr.vmem [resolvable:$true] %s35_s13  ;;  %s22_s15 = int_to_ptr.vmem [resolvable:$true] %s21_s15 }
   0x4   :  { %s161_s18 = scalar_lea.hbm %s330_s1, 256 }
   0x5   :  { %p162_p0 = scmp.ne.s32.totalorder %s330_s1, %s161_s18  ;;  %p165_p1 = scmp.lt.u32.totalorder %s161_s18, %s330_s1 }
   0x7   :  { %p167_p2 = pnand %p165_p1, %p162_p0 }
   0x9   :  { %170 = shalt.err (!%p167_p2)
}
   0xa   :  { %s171_s23 = scalar_lea.vmem %s36_s13, 256  ;;  %p176_p4 = scmp.lt.s32.totalorder %s36_s13, %s36_s13 }
   0xb   :  { %p172_p3 = scmp.ne.s32.totalorder %s36_s13, %s171_s23  ;;  %p177_p5 = scmp.lt.s32.totalorder %s171_s23, %s171_s23 }
   0xd   :  { %p178_p6 = por %p177_p5, %p176_p4 }
   0xf   :  { %p179_p7 = pnand %p178_p6, %p172_p3 }
  0x11   :  { %182 = shalt.err (!%p179_p7)
}
  0x12   :  { %38 = dma.hbm_to_vmem [thread:$0]  %s330_s1, 256, %s36_s13, [#allocation6]  }
  0x13   :  { %s183_s28 = scalar_lea.hbm %s329_s0, 256 }
  0x14   :  { %p184_p8 = scmp.ne.s32.totalorder %s329_s0, %s183_s28  ;;  %p187_p9 = scmp.lt.u32.totalorder %s183_s28, %s329_s0 }
  0x16   :  { %p189_p10 = pnand %p187_p9, %p184_p8 }
  0x18   :  { %192 = shalt.err (!%p189_p10)
}
  0x19   :  { %s193_s6 = scalar_lea.vmem %s22_s15, 256  ;;  %p198_p12 = scmp.lt.s32.totalorder %s22_s15, %s22_s15 }
  0x1a   :  { %p194_p11 = scmp.ne.s32.totalorder %s22_s15, %s193_s6  ;;  %p199_p13 = scmp.lt.s32.totalorder %s193_s6, %s193_s6 }
  0x1c   :  { %p200_p0 = por %p199_p13, %p198_p12 }
  0x1e   :  { %p201_p1 = pnand %p200_p0, %p194_p11 }
  0x20   :  { %204 = shalt.err (!%p201_p1)
}
  0x21   :  { %24 = dma.hbm_to_vmem [thread:$0]  %s329_s0, 256, %s22_s15, [#allocation3]  }
  0x22   :  { %s257_s8 = smov [#allocation7]   ;;  %s205_s12 = scalar_lea.hbm %s331_s2, 256 }
  0x23   :  { %s49_s9 = sshll.u32 %s257_s8, 4  ;;  %p206_p2 = scmp.ne.s32.totalorder %s331_s2, %s205_s12  ;;  %s50_s9 = int_to_ptr.vmem [resolvable:$true] %s49_s9 }
  0x24   :  { %p209_p3 = scmp.lt.u32.totalorder %s205_s12, %s331_s2 }
  0x26   :  { %p211_p4 = pnand %p209_p3, %p206_p2 }
  0x28   :  { %214 = shalt.err (!%p211_p4)
}
  0x29   :  { %s215_s18 = scalar_lea.vmem %s50_s9, 256  ;;  %p220_p6 = scmp.lt.s32.totalorder %s50_s9, %s50_s9 }
  0x2a   :  { %p216_p5 = scmp.ne.s32.totalorder %s50_s9, %s215_s18  ;;  %p221_p7 = scmp.lt.s32.totalorder %s215_s18, %s215_s18 }
  0x2c   :  { %p222_p8 = por %p221_p7, %p220_p6 }
  0x2e   :  { %p223_p9 = pnand %p222_p8, %p216_p5 }
  0x30   :  { %226 = shalt.err (!%p223_p9)
}
  0x31   :  { %52 = dma.hbm_to_vmem [thread:$0]  %s331_s2, 256, %s50_s9, [#allocation6]  }
  0x32   :  { %249 = dma.done.wait [#allocation3], 256  }
  0x33   :  { %250 = vsyncadd [#allocation3], 4294967040 }
  0x34   :  { %251 = dma.done.wait [#allocation6], 512  }
  0x35   :  { %252 = vsyncadd [#allocation6], 4294966784  ;;  %v77_v0 = vld [vmem:[#allocation2] sm:$0xff]  ;;  %v79_v1 = vld [vmem:[#allocation5] sm:$0xff]  ;;  %s258_s2 = smov [#allocation8]  }
  0x36   :  { %v81_v2 = vld [vmem:[#allocation7] sm:$0xff]  ;;  %v78_v5 = vld [vmem:[#allocation2 + $0x8] sm:$0xff]  ;;  %v80_v6 = vld [vmem:[#allocation5 + $0x8] sm:$0xff]  ;;  %s141_s19 = sshll.u32 %s258_s2, 4  ;;  %s142_s19 = int_to_ptr.vmem [resolvable:$true] %s141_s19 }
  0x37   :  { %v83_v3 = vmul.f32 %v81_v2, %v77_v0  ;;  %v85_v4 = vmul.f32 %v81_v2, %v79_v1  ;;  %v82_v7 = vld [vmem:[#allocation7 + $0x8] sm:$0xff]  ;;  %134 = vst [vmem:[#allocation8 + $0x30] sm:$0xff] %v81_v2  ;;  %s227_s20 = scalar_lea.vmem %s142_s19, 1024  ;;  %p232_p11 = scmp.lt.s32.totalorder %s142_s19, %s142_s19 }
  0x38   :  { %v84_v8 = vmul.f32 %v82_v7, %v78_v5  ;;  %v86_v9 = vmul.f32 %v82_v7, %v80_v6  ;;  %135 = vst [vmem:[#allocation8 + $0x38] sm:$0xff] %v82_v7  ;;  %p228_p10 = scmp.ne.s32.totalorder %s142_s19, %s227_s20  ;;  %p233_p12 = scmp.lt.s32.totalorder %s227_s20, %s227_s20 }
  0x39   :  { %v87_v10 = vsub.f32 %v83_v3, %v85_v4  ;;  %v93_v11 = vmax.f32 %v83_v3, %v85_v4 }
  0x3a   :  { %v88_v12 = vsub.f32 %v84_v8, %v86_v9  ;;  %v94_v13 = vmax.f32 %v84_v8, %v86_v9  ;;  %p234_p13 = por %p233_p12, %p232_p11 }
  0x3b   :  { %v89_v14 = vmul.f32 %v87_v10, %v81_v2  ;;  %vm95_vm0 = vcmp.ge.f32.partialorder %v93_v11, 0.1 }
  0x3c   :  { %v90_v15 = vmul.f32 %v88_v12, %v82_v7  ;;  %vm96_vm1 = vcmp.ge.f32.partialorder %v94_v13, 0.1  ;;  %v110_v16 = vsel %vm95_vm0, %v81_v2, 0.0  ;;  %p235_p0 = pnand %p234_p13, %p228_p10 }
  0x3d   :  { %v91_v17 = vmul.f32 %v89_v14, %v89_v14  ;;  %v111_v18 = vsel %vm96_vm1, %v82_v7, 0.0  ;;  %116 = vst [vmem:[#allocation8 + $0x10] sm:$0xff] %v110_v16 }
  0x3e   :  { %v92_v19 = vmul.f32 %v90_v15, %v90_v15  ;;  %117 = vst [vmem:[#allocation8 + $0x18] sm:$0xff] %v111_v18 }
  0x3f   :  { %v99_v20 = vsel %vm95_vm0, %v91_v17, 0.0  ;;  %125 = vst [vmem:[#allocation8 + $0x20] sm:$0xff] %v91_v17 }
  0x40   :  { %v100_v21 = vsel %vm96_vm1, %v92_v19, 0.0  ;;  %105 = vst [vmem:[#allocation8] sm:$0xff] %v99_v20  ;;  %126 = vst [vmem:[#allocation8 + $0x28] sm:$0xff] %v92_v19 }
  0x41   :  { %106 = vst [vmem:[#allocation8 + $0x8] sm:$0xff] %v100_v21 }
  0x42   :  { %238 = shalt.err (!%p235_p0)
}
  0x43   :  { %s239_s23 = scalar_lea.hbm %s332_s3, 1024 }
  0x44   :  { %p240_p1 = scmp.ne.s32.totalorder %s332_s3, %s239_s23  ;;  %p243_p2 = scmp.lt.u32.totalorder %s239_s23, %s332_s3 }
  0x46   :  { %p245_p3 = pnand %p243_p2, %p240_p1 }
  0x48   :  { %248 = shalt.err (!%p245_p3)
}
  0x49   :  { %s259_s28 = smov 256   ;;  %s260_s29 = smov 16  }
  0x4a   :  { %147 = dma.vmem_to_hbm [thread:$0]  %s142_s19, 1024, %s332_s3, [#allocation4], %s259_s28, %s259_s28, %s260_s29  }
  0x4b   :  { %253 = dma.done.wait [#allocation4], 1024  }
  0x4c   :  { %254 = vsyncadd [#allocation4], 4294966272 }
  0x4d   :  { %151 = vsyncpa [#allocation3], 1 }
  0x4e   :  { %152 = vsyncpa [#allocation6], 1 }
  0x4f   :  { %153 = vsyncpa [#allocation4], 1 }

</bundles_post_ra>
